<compile_context>
chip_gen: v6e
topology: v6e:2x2x1
jax: 0.10.0
libtpu: 0.0.40
codegen_flags: <defaults>
</compile_context>

<pallas_src>
import functools

import jax
import jax.numpy as jnp
from jax.experimental import pallas as pl
from jax.experimental.pallas import tpu as pltpu


def _lstm_linear_kernel(x_ref, const_ref, w_ih_ref, w_lin_ref, out_ref, *, nlayers, lane):
    """Single-timestep multi-layer LSTM + final Linear, fully VMEM-resident.

    x_ref    : (T, P)      layer-0 input rows, zero-padded beyond the first B lanes
    const_ref: (2L+1, 4P)  rows 0..L-1  : rec[l] = h0[l]@W_hh^T + b_ih + b_hh
                                          (per-gate 128-lane groups, order i,f,o,g)
                           rows L..2L-1 : c0[l] in lanes [0:B] (rest zero)
                           row  2L      : b_lin in lanes [0:B]
    w_ih_ref : (L, P, 4P)  W_ih^T, K padded to P, each gate in its own 128-lane group
    w_lin_ref: (L*P, B)    Linear weight; rows l*P..l*P+B-1 hold block l, transposed
    out_ref  : (T, B)
    """
    L = nlayers
    P = lane
    B = out_ref.shape[-1]

    x = x_ref[...]                                    # (T, P)
    h_parts = []
    for l in range(L):                                # static, unrolled layer loop
        # gates = x @ W_ih^T + (precomputed h0-recurrent term + biases)  -> (T, 4P)
        gates = (jnp.dot(x, w_ih_ref[l], preferred_element_type=jnp.float32)
                 + const_ref[l:l + 1, :])

        # gate groups are 128-lane aligned: every slice below is a whole-vreg view
        sig = jax.nn.sigmoid(gates[:, 0:3 * P])
        i_g = sig[:, 0 * P:1 * P]
        f_g = sig[:, 1 * P:2 * P]
        o_g = sig[:, 2 * P:3 * P]
        g_g = jnp.tanh(gates[:, 3 * P:4 * P])

        c_prev = const_ref[L + l:L + l + 1, 0:P]      # (1, P), broadcast over T rows
        c_new = f_g * c_prev + i_g * g_g
        h_new = o_g * jnp.tanh(c_new)                 # (T, P); padding lanes stay exactly 0
        h_parts.append(h_new)
        x = h_new                                     # input to the next layer

    # single final Linear matmul over all layers' hidden states
    h_all = jnp.concatenate(h_parts, axis=-1)         # (T, L*P), 128-aligned lane concat
    out = const_ref[2 * L:2 * L + 1, 0:B] + jnp.dot(
        h_all, w_lin_ref[...], preferred_element_type=jnp.float32)
    out_ref[...] = out


def prepare_params(h0, c0, w_ih, w_hh, b_ih, b_hh, w_lin, b_lin, *, lane=128):
    """One-time parameter preparation (h0/c0 are constant buffers of the module).

    h0, c0 : (L, 1, B)   w_ih, w_hh : (L, 4B, B)   b_ih, b_hh : (L, 4B)
    w_lin  : (B, L*B)    b_lin      : (B,)
    returns (const (2L+1, 4P), w_ih_pad (L, P, 4P), w_lin_pad (L*P, B))
    """
    L, _, B = h0.shape
    P = ((B + lane - 1) // lane) * lane
    f32 = jnp.float32
    h0 = h0.reshape(L, B).astype(f32)
    c0 = c0.reshape(L, B).astype(f32)
    w_ih = w_ih.astype(f32)
    w_hh = w_hh.astype(f32)
    b_ih = b_ih.astype(f32)
    b_hh = b_hh.astype(f32)
    w_lin = w_lin.astype(f32)
    b_lin = b_lin.astype(f32)

    # PyTorch gate row-blocks are [i, f, g, o]; kernel gate groups are [i, f, o, g]
    gate_src = (0, 1, 3, 2)

    # recurrent contribution, hoisted entirely out of the kernel:
    #   rec[l] = h0[l] @ W_hh[l]^T + b_ih[l] + b_hh[l]      -> (L, 4B)
    rec = jnp.einsum('lb,lgb->lg', h0, w_hh) + b_ih + b_hh

    # constants slab (2L+1, 4P): [rec (gate-padded) | c0 | b_lin]
    const = jnp.zeros((2 * L + 1, 4 * P), f32)
    for g_dst, g_src in enumerate(gate_src):
        const = const.at[0:L, g_dst * P:g_dst * P + B].set(rec[:, g_src * B:(g_src + 1) * B])
    const = const.at[L:2 * L, 0:B].set(c0)
    const = const.at[2 * L, 0:B].set(b_lin)

    # W_ih^T with K padded to P and each gate in its own 128-lane group: (L, P, 4P)
    w_ih_t = jnp.transpose(w_ih, (0, 2, 1))              # (L, B, 4B)
    w_ih_pad = jnp.zeros((L, P, 4 * P), f32)
    for g_dst, g_src in enumerate(gate_src):
        w_ih_pad = w_ih_pad.at[:, 0:B, g_dst * P:g_dst * P + B].set(
            w_ih_t[:, :, g_src * B:(g_src + 1) * B])

    # Linear weight as one (L*P, B) matrix; row block l holds W_lin[:, l*B:(l+1)*B]^T
    w_lin_t = jnp.transpose(w_lin.reshape(B, L, B), (1, 2, 0))   # (L, B, B)
    w_lin_pad = jnp.zeros((L * P, B), f32)
    for l in range(L):
        w_lin_pad = w_lin_pad.at[l * P:l * P + B, :].set(w_lin_t[l])

    return jax.device_put(const), jax.device_put(w_ih_pad), jax.device_put(w_lin_pad)


def model_forward(tr, const, w_ih_pad, w_lin_pad):
    """tr: (B,) single call (matches the PyTorch module) or (T, B) batched/amortized.

    Returns (B,) or (T, B) accordingly.
    """
    L, P, _ = w_ih_pad.shape
    B = w_lin_pad.shape[1]
    single = (tr.ndim == 1)
    tr2 = tr.reshape(1, B) if single else tr
    T = tr2.shape[0]

    # zero-pad the input rows to P lanes (layer-0 weight K-dim is padded to P)
    x = jnp.zeros((T, P), jnp.float32).at[:, 0:B].set(tr2.astype(jnp.float32))

    vmem = pl.BlockSpec(memory_space=pltpu.MemorySpace.VMEM)
    flops = 2 * T * (L * P * 4 * P + L * P * B)
    transcendentals = T * L * (4 * P + P)                 # 3P sigmoid + 2P tanh per layer
    bytes_accessed = 4 * (x.size + const.size + w_ih_pad.size + w_lin_pad.size + T * B)

    kern = functools.partial(_lstm_linear_kernel, nlayers=L, lane=P)
    out = pl.pallas_call(
        kern,
        out_shape=jax.ShapeDtypeStruct((T, B), jnp.float32),
        in_specs=[vmem, vmem, vmem, vmem],
        out_specs=vmem,
        cost_estimate=pl.CostEstimate(flops=flops,
                                      transcendentals=transcendentals,
                                      bytes_accessed=bytes_accessed),
    )(x, const, w_ih_pad, w_lin_pad)
    return out.reshape(B) if single else out


def _reference_forward(tr, h0, c0, w_ih, w_hh, b_ih, b_hh, w_lin, b_lin):
    """Pure-JAX reference of the PyTorch forward (eval mode)."""
    L, _, B = h0.shape
    x = tr.reshape(1, B)
    h_outs = []
    for l in range(L):
        gates = x @ w_ih[l].T + h0[l] @ w_hh[l].T + b_ih[l] + b_hh[l]
        i_g = jax.nn.sigmoid(gates[:, 0 * B:1 * B])
        f_g = jax.nn.sigmoid(gates[:, 1 * B:2 * B])
        g_g = jnp.tanh(gates[:, 2 * B:3 * B])
        o_g = jax.nn.sigmoid(gates[:, 3 * B:4 * B])
        c_new = f_g * c0[l] + i_g * g_g
        h_new = o_g * jnp.tanh(c_new)
        h_outs.append(h_new)
        x = h_new
    h_flat = jnp.concatenate(h_outs, axis=-1).reshape(-1)   # (L*B,)
    return w_lin @ h_flat + b_lin                            # (B,)


if __name__ == "__main__":
    bsize = 32      # B: LSTM input_size == hidden_size == linear out_features
    nlayers = 2     # L

    key = jax.random.PRNGKey(0)
    keys = jax.random.split(key, 10)

    B, L = bsize, nlayers
    scale = 1.0 / jnp.sqrt(jnp.float32(B))   # PyTorch-style uniform(-1/sqrt(H), 1/sqrt(H))

    tr = jax.random.normal(keys[0], (B,), dtype=jnp.float32)
    h0 = jax.random.normal(keys[1], (L, 1, B), dtype=jnp.float32)
    c0 = jax.random.normal(keys[2], (L, 1, B), dtype=jnp.float32)
    w_ih = jax.random.uniform(keys[3], (L, 4 * B, B), minval=-scale, maxval=scale)
    w_hh = jax.random.uniform(keys[4], (L, 4 * B, B), minval=-scale, maxval=scale)
    b_ih = jax.random.uniform(keys[5], (L, 4 * B), minval=-scale, maxval=scale)
    b_hh = jax.random.uniform(keys[6], (L, 4 * B), minval=-scale, maxval=scale)
    lin_scale = 1.0 / jnp.sqrt(jnp.float32(B * L))
    w_lin = jax.random.uniform(keys[7], (B, L * B), minval=-lin_scale, maxval=lin_scale)
    b_lin = jax.random.uniform(keys[8], (B,), minval=-lin_scale, maxval=lin_scale)

    # One-time parameter preparation (transposes, gate padding/reorder, rec precompute).
    const, w_ih_pad, w_lin_pad = prepare_params(h0, c0, w_ih, w_hh, b_ih, b_hh, w_lin, b_lin)

    # Single-call forward (matches the PyTorch module's forward(tr)).
    out = model_forward(tr, const, w_ih_pad, w_lin_pad)
    out = jax.block_until_ready(out)
    ref = _reference_forward(tr, h0, c0, w_ih, w_hh, b_ih, b_hh, w_lin, b_lin)
    assert out.shape == (B,)
    assert jnp.allclose(out, ref, atol=1e-5, rtol=1e-5), "mismatch vs JAX reference (single)"

    # Amortized path: T independent tr rows in ONE pallas_call (weights DMA'd once).
    T = 8
    trs = jax.random.normal(keys[9], (T, B), dtype=jnp.float32)
    outs = model_forward(trs, const, w_ih_pad, w_lin_pad)
    outs = jax.block_until_ready(outs)
    refs = jnp.stack([_reference_forward(trs[t], h0, c0, w_ih, w_hh, b_ih, b_hh, w_lin, b_lin)
                      for t in range(T)])
    assert outs.shape == (T, B)
    assert jnp.allclose(outs, refs, atol=1e-5, rtol=1e-5), "mismatch vs JAX reference (batched)"

    print("KERNEL_OK")
</pallas_src>

<mosaic_0001>
module attributes {stable_mosaic.version = 11 : i64} {
  func.func @_lstm_linear_kernel(%arg0: memref<1x128xf32, #tpu.memory_space<vmem>>, %arg1: memref<5x512xf32, #tpu.memory_space<vmem>>, %arg2: memref<2x128x512xf32, #tpu.memory_space<vmem>>, %arg3: memref<256x32xf32, #tpu.memory_space<vmem>>, %arg4: memref<1x32xf32, #tpu.memory_space<vmem>>) attributes {dimension_semantics = [], scalar_prefetch = 0 : i64, scratch_operands = 0 : i64, tpu.core_type = #tpu.core_type<tc>} {
    %c0 = arith.constant 0 : index
    %c0_0 = arith.constant 0 : index
    %0 = vector.load %arg0[%c0, %c0_0] : memref<1x128xf32, #tpu.memory_space<vmem>>, vector<1x128xf32>
    %c0_1 = arith.constant 0 : index
    %c0_2 = arith.constant 0 : index
    %c0_3 = arith.constant 0 : index
    %1 = vector.load %arg2[%c0_1, %c0_2, %c0_3] : memref<2x128x512xf32, #tpu.memory_space<vmem>>, vector<1x128x512xf32>
    %2 = vector.shape_cast %1 : vector<1x128x512xf32> to vector<128x512xf32>
    %cst = arith.constant dense<0.000000e+00> : vector<1x512xf32>
    %3 = tpu.matmul %0, %2, %cst {dimension_numbers = #tpu.dot_dimension_numbers<[1], [0], [0], [1], [0, 0, 1, 1], [], []>} : vector<1x128xf32>, vector<128x512xf32>, vector<1x512xf32> -> vector<1x512xf32>
    %c0_4 = arith.constant 0 : index
    %c0_5 = arith.constant 0 : index
    %4 = vector.load %arg1[%c0_4, %c0_5] : memref<5x512xf32, #tpu.memory_space<vmem>>, vector<1x512xf32>
    %5 = arith.addf %3, %4 : vector<1x512xf32>
    %6 = vector.extract_strided_slice %5 {offsets = [0, 0], sizes = [1, 384], strides = [1, 1]} : vector<1x512xf32> to vector<1x384xf32>
    %7 = arith.negf %6 : vector<1x384xf32>
    %8 = math.exp %7 : vector<1x384xf32>
    %cst_6 = arith.constant 1.000000e+00 : f32
    %9 = vector.broadcast %cst_6 : f32 to vector<1x384xf32>
    %10 = arith.addf %9, %8 : vector<1x384xf32>
    %11 = arith.divf %9, %10 : vector<1x384xf32>
    %12 = vector.extract_strided_slice %11 {offsets = [0, 0], sizes = [1, 128], strides = [1, 1]} : vector<1x384xf32> to vector<1x128xf32>
    %13 = vector.extract_strided_slice %11 {offsets = [0, 128], sizes = [1, 128], strides = [1, 1]} : vector<1x384xf32> to vector<1x128xf32>
    %14 = vector.extract_strided_slice %11 {offsets = [0, 256], sizes = [1, 128], strides = [1, 1]} : vector<1x384xf32> to vector<1x128xf32>
    %15 = vector.extract_strided_slice %5 {offsets = [0, 384], sizes = [1, 128], strides = [1, 1]} : vector<1x512xf32> to vector<1x128xf32>
    %16 = math.tanh %15 : vector<1x128xf32>
    %c2 = arith.constant 2 : index
    %c0_7 = arith.constant 0 : index
    %17 = vector.load %arg1[%c2, %c0_7] : memref<5x512xf32, #tpu.memory_space<vmem>>, vector<1x128xf32>
    %18 = arith.mulf %13, %17 : vector<1x128xf32>
    %19 = arith.mulf %12, %16 : vector<1x128xf32>
    %20 = arith.addf %18, %19 : vector<1x128xf32>
    %21 = math.tanh %20 : vector<1x128xf32>
    %22 = arith.mulf %14, %21 : vector<1x128xf32>
    %c1 = arith.constant 1 : index
    %c0_8 = arith.constant 0 : index
    %c0_9 = arith.constant 0 : index
    %23 = vector.load %arg2[%c1, %c0_8, %c0_9] : memref<2x128x512xf32, #tpu.memory_space<vmem>>, vector<1x128x512xf32>
    %24 = vector.shape_cast %23 : vector<1x128x512xf32> to vector<128x512xf32>
    %cst_10 = arith.constant dense<0.000000e+00> : vector<1x512xf32>
    %25 = tpu.matmul %22, %24, %cst_10 {dimension_numbers = #tpu.dot_dimension_numbers<[1], [0], [0], [1], [0, 0, 1, 1], [], []>} : vector<1x128xf32>, vector<128x512xf32>, vector<1x512xf32> -> vector<1x512xf32>
    %c1_11 = arith.constant 1 : index
    %c0_12 = arith.constant 0 : index
    %26 = vector.load %arg1[%c1_11, %c0_12] : memref<5x512xf32, #tpu.memory_space<vmem>>, vector<1x512xf32>
    %27 = arith.addf %25, %26 : vector<1x512xf32>
    %28 = vector.extract_strided_slice %27 {offsets = [0, 0], sizes = [1, 384], strides = [1, 1]} : vector<1x512xf32> to vector<1x384xf32>
    %29 = arith.negf %28 : vector<1x384xf32>
    %30 = math.exp %29 : vector<1x384xf32>
    %cst_13 = arith.constant 1.000000e+00 : f32
    %31 = vector.broadcast %cst_13 : f32 to vector<1x384xf32>
    %32 = arith.addf %31, %30 : vector<1x384xf32>
    %33 = arith.divf %31, %32 : vector<1x384xf32>
    %34 = vector.extract_strided_slice %33 {offsets = [0, 0], sizes = [1, 128], strides = [1, 1]} : vector<1x384xf32> to vector<1x128xf32>
    %35 = vector.extract_strided_slice %33 {offsets = [0, 128], sizes = [1, 128], strides = [1, 1]} : vector<1x384xf32> to vector<1x128xf32>
    %36 = vector.extract_strided_slice %33 {offsets = [0, 256], sizes = [1, 128], strides = [1, 1]} : vector<1x384xf32> to vector<1x128xf32>
    %37 = vector.extract_strided_slice %27 {offsets = [0, 384], sizes = [1, 128], strides = [1, 1]} : vector<1x512xf32> to vector<1x128xf32>
    %38 = math.tanh %37 : vector<1x128xf32>
    %c3 = arith.constant 3 : index
    %c0_14 = arith.constant 0 : index
    %39 = vector.load %arg1[%c3, %c0_14] : memref<5x512xf32, #tpu.memory_space<vmem>>, vector<1x128xf32>
    %40 = arith.mulf %35, %39 : vector<1x128xf32>
    %41 = arith.mulf %34, %38 : vector<1x128xf32>
    %42 = arith.addf %40, %41 : vector<1x128xf32>
    %43 = math.tanh %42 : vector<1x128xf32>
    %44 = arith.mulf %36, %43 : vector<1x128xf32>
    %45 = tpu.concatenate %22, %44 in 1 : vector<1x128xf32>, vector<1x128xf32> -> vector<1x256xf32>
    %c4 = arith.constant 4 : index
    %c0_15 = arith.constant 0 : index
    %46 = vector.load %arg1[%c4, %c0_15] : memref<5x512xf32, #tpu.memory_space<vmem>>, vector<1x32xf32>
    %c0_16 = arith.constant 0 : index
    %c0_17 = arith.constant 0 : index
    %47 = vector.load %arg3[%c0_16, %c0_17] : memref<256x32xf32, #tpu.memory_space<vmem>>, vector<256x32xf32>
    %cst_18 = arith.constant dense<0.000000e+00> : vector<1x32xf32>
    %48 = tpu.matmul %45, %47, %cst_18 {dimension_numbers = #tpu.dot_dimension_numbers<[1], [0], [0], [1], [0, 0, 1, 1], [], []>} : vector<1x256xf32>, vector<256x32xf32>, vector<1x32xf32> -> vector<1x32xf32>
    %49 = arith.addf %46, %48 : vector<1x32xf32>
    %c0_19 = arith.constant 0 : index
    %c0_20 = arith.constant 0 : index
    %50 = vector.load %arg4[%c0_19, %c0_20] : memref<1x32xf32, #tpu.memory_space<vmem>>, vector<1x32xf32>
    tpu.vector_store %arg4[%c0_19, %c0_20], %49 {strides = array<i32>} : memref<1x32xf32, #tpu.memory_space<vmem>>, vector<1x32xf32>,
    return
  }
}

</mosaic_0001>

<bundles_post_ra>
// kernel: tpu_custom_call.1
= control target key start
LH: loop header
LB: loop body
LE: loop exit
PB: predicated region body
PF: predicated region fallthrough
CT: control target
= control target key end

     0   :  { %9 = vsyncpa [#allocation3], 0  ;;  %s966_s0 = inlined_call_operand.vmem [shape: f32[1,128], index: 0, kind: input, shape index: {}]   ;;  %s967_s1 = inlined_call_operand.vmem [shape: f32[5,512], index: 1, kind: input, shape index: {}]   ;;  %s968_s2 = inlined_call_operand.hbm [shape: f32[2,128,512], index: 2, kind: input, shape index: {}]   ;;  %s969_s3 = inlined_call_operand.vmem [shape: f32[256,32], index: 3, kind: input, shape index: {}]   ;;  %s970_s4 = inlined_call_operand.hbm [shape: f32[1,32], index: 4, kind: output, shape index: {}]  }
   0x1   :  { %10 = vsyncpa [#allocation4], 0  ;;  %s785_s15 = smov [#allocation2]  }
   0x2   :  { %s20_s16 = sshll.u32 %s785_s15, 4  ;;  %s21_s16 = int_to_ptr.vmem [resolvable:$true] %s20_s16 }
   0x3   :  { %s749_s17 = scalar_lea.vmem %s21_s16, 16384  ;;  %p754_p1 = scmp.lt.s32.totalorder %s21_s16, %s21_s16 }
   0x4   :  { %p750_p0 = scmp.ne.s32.totalorder %s21_s16, %s749_s17  ;;  %p755_p2 = scmp.lt.s32.totalorder %s749_s17, %s749_s17 }
   0x6   :  { %p756_p3 = por %p755_p2, %p754_p1 }
   0x8   :  { %p757_p4 = pnand %p756_p3, %p750_p0 }
   0xa   :  { %760 = shalt.err (!%p757_p4)
}
   0xb   :  { %s786_s18 = smov 512   ;;  %s787_s19 = smov 32  }
   0xc   :  { %26 = dma.hbm_to_vmem [thread:$0]  %s968_s2, 16384, %s21_s16, [#allocation3], %s786_s18, %s786_s18, %s787_s19  }
   0xd   :  { %781 = dma.done.wait [#allocation3], 16384  }
   0xe   :  { %782 = vsyncadd [#allocation3], 4294950912  ;;  %v788_v0 = vmov 0.0   ;;  %v94_v1 = vld [vmem:[#allocation2 + $0x1e8] sm:$0xff]  ;;  %v93_v2 = vld [vmem:[#allocation2 + $0x1e0] sm:$0xff]  ;;  %s789_s13 = smov [#allocation5]  }
   0xf   :  { %183 = vmatprep.mubr.f32.mxu0 %v788_v0  ;;  %254 = vmatprep.mubr.f32.mxu1 %v788_v0  ;;  %v90_v3 = vld [vmem:[#allocation2 + $0x1c8] sm:$0xff]  ;;  %v89_v4 = vld [vmem:[#allocation2 + $0x1c0] sm:$0xff]  ;;  %v96_v9 = vld [vmem:[#allocation2 + $0x1f8] sm:$0xff]  ;;  %s653_s14 = sshll.u32 %s789_s13, 4  ;;  %vm645_vm0 = vcmask 253952   ;;  %s654_s14 = int_to_ptr.vmem [resolvable:$true] %s653_s14 }
  0x10   :  { %119 = vmatprep.subr.mxu0 %v94_v1  ;;  %v86_v5 = vld [vmem:[#allocation2 + $0x1a8] sm:$0xff]  ;;  %v85_v6 = vld [vmem:[#allocation2 + $0x1a0] sm:$0xff]  ;;  %190 = vmatprep.subr.mxu1 %v96_v9  ;;  %v95_v11 = vld [vmem:[#allocation2 + $0x1f0] sm:$0xff]  ;;  %s761_s15 = scalar_lea.vmem %s654_s14, 16  ;;  %s765_s16 = scalar_lea.vmem %s654_s14, 32 }
  0x11   :  { %120 = vmatpush1.msra.mxu0 %v93_v2  ;;  %v82_v7 = vld [vmem:[#allocation2 + $0x188] sm:$0xff]  ;;  %v81_v8 = vld [vmem:[#allocation2 + $0x180] sm:$0xff]  ;;  %191 = vmatpush1.msra.mxu1 %v95_v11  ;;  %v92_v13 = vld [vmem:[#allocation2 + $0x1d8] sm:$0xff]  ;;  %p762_p5 = scmp.ne.s32.totalorder %s654_s14, %s761_s15  ;;  %p766_p6 = scmp.lt.s32.totalorder %s654_s14, %s654_s14 }
  0x12   :  { %121 = vmatprep.subr.mxu0 %v90_v3  ;;  %v78_v10 = vld [vmem:[#allocation2 + $0x168] sm:$0xff]  ;;  %v77_v12 = vld [vmem:[#allocation2 + $0x160] sm:$0xff]  ;;  %v91_v14 = vld [vmem:[#allocation2 + $0x1d0] sm:$0xff]  ;;  %192 = vmatprep.subr.mxu1 %v92_v13  ;;  %p767_p7 = scmp.lt.s32.totalorder %s765_s16, %s761_s15 }
  0x13   :  { %122 = vmatpush1.msra.mxu0 %v89_v4  ;;  %v74_v15 = vld [vmem:[#allocation2 + $0x148] sm:$0xff]  ;;  %v88_v16 = vld [vmem:[#allocation2 + $0x1b8] sm:$0xff]  ;;  %v73_v17 = vld [vmem:[#allocation2 + $0x140] sm:$0xff]  ;;  %193 = vmatpush1.msra.mxu1 %v91_v14 }
  0x14   :  { %123 = vmatprep.subr.mxu0 %v86_v5  ;;  %v87_v18 = vld [vmem:[#allocation2 + $0x1b0] sm:$0xff]  ;;  %v84_v19 = vld [vmem:[#allocation2 + $0x198] sm:$0xff]  ;;  %v70_v20 = vld [vmem:[#allocation2 + $0x128] sm:$0xff]  ;;  %194 = vmatprep.subr.mxu1 %v88_v16  ;;  %p768_p8 = por %p767_p7, %p766_p6 }
  0x15   :  { %124 = vmatpush1.msra.mxu0 %v85_v6  ;;  %v83_v21 = vld [vmem:[#allocation2 + $0x190] sm:$0xff]  ;;  %v69_v22 = vld [vmem:[#allocation2 + $0x120] sm:$0xff]  ;;  %195 = vmatpush1.msra.mxu1 %v87_v18  ;;  %v80_v23 = vld [vmem:[#allocation2 + $0x178] sm:$0xff] }
  0x16   :  { %125 = vmatprep.subr.mxu0 %v82_v7  ;;  %v66_v24 = vld [vmem:[#allocation2 + $0x108] sm:$0xff]  ;;  %196 = vmatprep.subr.mxu1 %v84_v19  ;;  %v79_v25 = vld [vmem:[#allocation2 + $0x170] sm:$0xff]  ;;  %v65_v26 = vld [vmem:[#allocation2 + $0x100] sm:$0xff]  ;;  %p769_p9 = pnand %p768_p8, %p762_p5 }
  0x17   :  { %126 = vmatpush1.msra.mxu0 %v81_v8  ;;  %197 = vmatpush1.msra.mxu1 %v83_v21  ;;  %v76_v27 = vld [vmem:[#allocation2 + $0x158] sm:$0xff]  ;;  %v62_v28 = vld [vmem:[#allocation2 + $0xe8] sm:$0xff]  ;;  %v75_v29 = vld [vmem:[#allocation2 + $0x150] sm:$0xff] }
  0x18   :  { %127 = vmatprep.subr.mxu0 %v78_v10  ;;  %198 = vmatprep.subr.mxu1 %v80_v23  ;;  %v61_v30 = vld [vmem:[#allocation2 + $0xe0] sm:$0xff]  ;;  %v72_v31 = vld [vmem:[#allocation2 + $0x138] sm:$0xff]  ;;  %v58_v32 = vld [vmem:[#allocation2 + $0xc8] sm:$0xff] }
  0x19   :  { %128 = vmatpush1.msra.mxu0 %v77_v12  ;;  %199 = vmatpush1.msra.mxu1 %v79_v25  ;;  %v71_v33 = vld [vmem:[#allocation2 + $0x130] sm:$0xff]  ;;  %v57_v34 = vld [vmem:[#allocation2 + $0xc0] sm:$0xff]  ;;  %v68_v35 = vld [vmem:[#allocation2 + $0x118] sm:$0xff] }
  0x1a   :  { %129 = vmatprep.subr.mxu0 %v74_v15  ;;  %200 = vmatprep.subr.mxu1 %v76_v27  ;;  %v54_v36 = vld [vmem:[#allocation2 + $0xa8] sm:$0xff]  ;;  %v67_v37 = vld [vmem:[#allocation2 + $0x110] sm:$0xff]  ;;  %v53_v38 = vld [vmem:[#allocation2 + $0xa0] sm:$0xff] }
  0x1b   :  { %130 = vmatpush1.msra.mxu0 %v73_v17  ;;  %201 = vmatpush1.msra.mxu1 %v75_v29  ;;  %v64_v39 = vld [vmem:[#allocation2 + $0xf8] sm:$0xff]  ;;  %v50_v40 = vld [vmem:[#allocation2 + $0x88] sm:$0xff]  ;;  %v63_v41 = vld [vmem:[#allocation2 + $0xf0] sm:$0xff] }
  0x1c   :  { %131 = vmatprep.subr.mxu0 %v70_v20  ;;  %202 = vmatprep.subr.mxu1 %v72_v31  ;;  %v49_v42 = vld [vmem:[#allocation2 + $0x80] sm:$0xff]  ;;  %v60_v43 = vld [vmem:[#allocation2 + $0xd8] sm:$0xff]  ;;  %v46_v44 = vld [vmem:[#allocation2 + $0x68] sm:$0xff] }
  0x1d   :  { %132 = vmatpush1.msra.mxu0 %v69_v22  ;;  %203 = vmatpush1.msra.mxu1 %v71_v33  ;;  %v59_v45 = vld [vmem:[#allocation2 + $0xd0] sm:$0xff]  ;;  %v45_v46 = vld [vmem:[#allocation2 + $0x60] sm:$0xff]  ;;  %v56_v47 = vld [vmem:[#allocation2 + $0xb8] sm:$0xff] }
  0x1e   :  { %133 = vmatprep.subr.mxu0 %v66_v24  ;;  %204 = vmatprep.subr.mxu1 %v68_v35  ;;  %v42_v48 = vld [vmem:[#allocation2 + $0x48] sm:$0xff]  ;;  %v55_v49 = vld [vmem:[#allocation2 + $0xb0] sm:$0xff]  ;;  %v41_v50 = vld [vmem:[#allocation2 + $0x40] sm:$0xff] }
  0x1f   :  { %134 = vmatpush1.msra.mxu0 %v65_v26  ;;  %205 = vmatpush1.msra.mxu1 %v67_v37  ;;  %v52_v51 = vld [vmem:[#allocation2 + $0x98] sm:$0xff]  ;;  %v38_v52 = vld [vmem:[#allocation2 + $0x28] sm:$0xff]  ;;  %v51_v53 = vld [vmem:[#allocation2 + $0x90] sm:$0xff] }
  0x20   :  { %135 = vmatprep.subr.mxu0 %v62_v28  ;;  %206 = vmatprep.subr.mxu1 %v64_v39  ;;  %v37_v54 = vld [vmem:[#allocation2 + $0x20] sm:$0xff]  ;;  %v48_v55 = vld [vmem:[#allocation2 + $0x78] sm:$0xff]  ;;  %v34_v56 = vld [vmem:[#allocation2 + $0x8] sm:$0xff] }
  0x21   :  { %136 = vmatpush1.msra.mxu0 %v61_v30  ;;  %207 = vmatpush1.msra.mxu1 %v63_v41  ;;  %v47_v57 = vld [vmem:[#allocation2 + $0x70] sm:$0xff]  ;;  %v33_v58 = vld [vmem:[#allocation2] sm:$0xff]  ;;  %v44_v59 = vld [vmem:[#allocation2 + $0x58] sm:$0xff] }
  0x22   :  { %137 = vmatprep.subr.mxu0 %v58_v32  ;;  %208 = vmatprep.subr.mxu1 %v60_v43  ;;  %v32_v60 = vld [vmem:[%s966_s0] sm:$0x1]  ;;  %v43_v61 = vld [vmem:[#allocation2 + $0x50] sm:$0xff]  ;;  %v40_v62 = vld [vmem:[#allocation2 + $0x38] sm:$0xff] }
  0x23   :  { %138 = vmatpush1.msra.mxu0 %v57_v34  ;;  %209 = vmatpush1.msra.mxu1 %v59_v45  ;;  %v39_v63 = vld [vmem:[#allocation2 + $0x30] sm:$0xff]  ;;  %v36_v1 = vld [vmem:[#allocation2 + $0x18] sm:$0xff]  ;;  %v348_v3 = vld [vmem:[#allocation2 + $0x3e8] sm:$0xff] }
  0x24   :  { %139 = vmatprep.subr.mxu0 %v54_v36  ;;  %210 = vmatprep.subr.mxu1 %v56_v47  ;;  %v35_v2 = vld [vmem:[#allocation2 + $0x10] sm:$0xff]  ;;  %v350_v4 = vld [vmem:[#allocation2 + $0x3f8] sm:$0xff]  ;;  %v347_v5 = vld [vmem:[#allocation2 + $0x3e0] sm:$0xff] }
  0x25   :  { %140 = vmatpush1.msra.mxu0 %v53_v38  ;;  %211 = vmatpush1.msra.mxu1 %v55_v49  ;;  %v349_v6 = vld [vmem:[#allocation2 + $0x3f0] sm:$0xff]  ;;  %v344_v7 = vld [vmem:[#allocation2 + $0x3c8] sm:$0xff]  ;;  %v346_v8 = vld [vmem:[#allocation2 + $0x3d8] sm:$0xff] }
  0x26   :  { %141 = vmatprep.subr.mxu0 %v50_v40  ;;  %212 = vmatprep.subr.mxu1 %v52_v51  ;;  %v343_v9 = vld [vmem:[#allocation2 + $0x3c0] sm:$0xff]  ;;  %v345_v10 = vld [vmem:[#allocation2 + $0x3d0] sm:$0xff]  ;;  %v340_v11 = vld [vmem:[#allocation2 + $0x3a8] sm:$0xff] }
  0x27   :  { %142 = vmatpush1.msra.mxu0 %v49_v42  ;;  %213 = vmatpush1.msra.mxu1 %v51_v53  ;;  %v342_v12 = vld [vmem:[#allocation2 + $0x3b8] sm:$0xff]  ;;  %v341_v13 = vld [vmem:[#allocation2 + $0x3b0] sm:$0xff]  ;;  %v336_v14 = vld [vmem:[#allocation2 + $0x388] sm:$0xff] }
  0x28   :  { %143 = vmatprep.subr.mxu0 %v46_v44  ;;  %214 = vmatprep.subr.mxu1 %v48_v55  ;;  %v338_v15 = vld [vmem:[#allocation2 + $0x398] sm:$0xff]  ;;  %v335_v16 = vld [vmem:[#allocation2 + $0x380] sm:$0xff]  ;;  %v337_v17 = vld [vmem:[#allocation2 + $0x390] sm:$0xff] }
  0x29   :  { %144 = vmatpush1.msra.mxu0 %v45_v46  ;;  %215 = vmatpush1.msra.mxu1 %v47_v57  ;;  %v332_v18 = vld [vmem:[#allocation2 + $0x368] sm:$0xff]  ;;  %v334_v19 = vld [vmem:[#allocation2 + $0x378] sm:$0xff]  ;;  %v331_v20 = vld [vmem:[#allocation2 + $0x360] sm:$0xff] }
  0x2a   :  { %145 = vmatprep.subr.mxu0 %v42_v48  ;;  %216 = vmatprep.subr.mxu1 %v44_v59  ;;  %v333_v21 = vld [vmem:[#allocation2 + $0x370] sm:$0xff]  ;;  %v328_v22 = vld [vmem:[#allocation2 + $0x348] sm:$0xff]  ;;  %v330_v23 = vld [vmem:[#allocation2 + $0x358] sm:$0xff] }
  0x2b   :  { %146 = vmatpush1.msra.mxu0 %v41_v50  ;;  %217 = vmatpush1.msra.mxu1 %v43_v61  ;;  %v327_v24 = vld [vmem:[#allocation2 + $0x340] sm:$0xff]  ;;  %v329_v25 = vld [vmem:[#allocation2 + $0x350] sm:$0xff]  ;;  %v324_v26 = vld [vmem:[#allocation2 + $0x328] sm:$0xff] }
  0x2c   :  { %147 = vmatprep.subr.mxu0 %v38_v52  ;;  %218 = vmatprep.subr.mxu1 %v40_v62  ;;  %v326_v27 = vld [vmem:[#allocation2 + $0x338] sm:$0xff]  ;;  %v323_v28 = vld [vmem:[#allocation2 + $0x320] sm:$0xff]  ;;  %v325_v29 = vld [vmem:[#allocation2 + $0x330] sm:$0xff] }
  0x2d   :  { %148 = vmatpush1.msra.mxu0 %v37_v54  ;;  %219 = vmatpush1.msra.mxu1 %v39_v63  ;;  %v320_v30 = vld [vmem:[#allocation2 + $0x308] sm:$0xff]  ;;  %v322_v31 = vld [vmem:[#allocation2 + $0x318] sm:$0xff]  ;;  %v319_v32 = vld [vmem:[#allocation2 + $0x300] sm:$0xff] }
  0x2e   :  { %149 = vmatprep.subr.mxu0 %v34_v56  ;;  %220 = vmatprep.subr.mxu1 %v36_v1  ;;  %v321_v33 = vld [vmem:[#allocation2 + $0x310] sm:$0xff]  ;;  %v316_v34 = vld [vmem:[#allocation2 + $0x2e8] sm:$0xff]  ;;  %v318_v35 = vld [vmem:[#allocation2 + $0x2f8] sm:$0xff] }
  0x2f   :  { %150 = vmatpush1.msra.mxu0 %v33_v58  ;;  %221 = vmatpush1.msra.mxu1 %v35_v2  ;;  %v315_v36 = vld [vmem:[#allocation2 + $0x2e0] sm:$0xff]  ;;  %v317_v37 = vld [vmem:[#allocation2 + $0x2f0] sm:$0xff]  ;;  %v312_v38 = vld [vmem:[#allocation2 + $0x2c8] sm:$0xff] }
  0x30   :  { %184 = vmatmul.mubr.f32.vlgmr.msra.gmra.mxu0 %v32_v60  ;;  %255 = vmatmul.mubr.f32.vlgmr.msra.gmra.mxu1 %v32_v60  ;;  %v314_v39 = vld [vmem:[#allocation2 + $0x2d8] sm:$0xff]  ;;  %v311_v40 = vld [vmem:[#allocation2 + $0x2c0] sm:$0xff]  ;;  %v313_v41 = vld [vmem:[#allocation2 + $0x2d0] sm:$0xff] }
  0x31   :  { %438 = vmatprep.mubr.f32.mxu0 %v788_v0  ;;  %509 = vmatprep.mubr.f32.mxu1 %v788_v0  ;;  %v339_v0 = vld [vmem:[#allocation2 + $0x3a0] sm:$0xff]  ;;  %v308_v42 = vld [vmem:[#allocation2 + $0x2a8] sm:$0xff]  ;;  %v310_v43 = vld [vmem:[#allocation2 + $0x2b8] sm:$0xff] }
  0x32   :  { %374 = vmatprep.subr.mxu0 %v348_v3  ;;  %445 = vmatprep.subr.mxu1 %v350_v4  ;;  %v307_v44 = vld [vmem:[#allocation2 + $0x2a0] sm:$0xff]  ;;  %v309_v45 = vld [vmem:[#allocation2 + $0x2b0] sm:$0xff]  ;;  %v304_v46 = vld [vmem:[#allocation2 + $0x288] sm:$0xff]  ;;  %v99_v3 = vlaneseq }
  0x33   :  { %375 = vmatpush1.msra.mxu0 %v347_v5  ;;  %446 = vmatpush1.msra.mxu1 %v349_v6  ;;  %v306_v47 = vld [vmem:[#allocation2 + $0x298] sm:$0xff]  ;;  %v303_v48 = vld [vmem:[#allocation2 + $0x280] sm:$0xff]  ;;  %v305_v49 = vld [vmem:[#allocation2 + $0x290] sm:$0xff] }
  0x34   :  { %376 = vmatprep.subr.mxu0 %v344_v7  ;;  %447 = vmatprep.subr.mxu1 %v346_v8  ;;  %v300_v50 = vld [vmem:[#allocation2 + $0x268] sm:$0xff]  ;;  %v302_v51 = vld [vmem:[#allocation2 + $0x278] sm:$0xff]  ;;  %v299_v52 = vld [vmem:[#allocation2 + $0x260] sm:$0xff]  ;;  %v825_v4 = vshrl.u32 %v99_v3, 7 }
  0x35   :  { %377 = vmatpush1.msra.mxu0 %v343_v9  ;;  %448 = vmatpush1.msra.mxu1 %v345_v10  ;;  %v301_v53 = vld [vmem:[#allocation2 + $0x270] sm:$0xff]  ;;  %v296_v54 = vld [vmem:[#allocation2 + $0x248] sm:$0xff]  ;;  %v298_v55 = vld [vmem:[#allocation2 + $0x258] sm:$0xff] }
  0x36   :  { %378 = vmatprep.subr.mxu0 %v340_v11  ;;  %449 = vmatprep.subr.mxu1 %v342_v12  ;;  %v295_v56 = vld [vmem:[#allocation2 + $0x240] sm:$0xff]  ;;  %v297_v57 = vld [vmem:[#allocation2 + $0x250] sm:$0xff]  ;;  %v292_v58 = vld [vmem:[#allocation2 + $0x228] sm:$0xff]  ;;  %v101_v5 = vsub.s32 0, %v825_v4  ;;  %v105_v7 = vsub.s32 1, %v825_v4 }
  0x37   :  { %379 = vmatpush1.msra.mxu0 %v339_v0  ;;  %450 = vmatpush1.msra.mxu1 %v341_v13  ;;  %v294_v59 = vld [vmem:[#allocation2 + $0x238] sm:$0xff]  ;;  %v291_v60 = vld [vmem:[#allocation2 + $0x220] sm:$0xff]  ;;  %v293_v61 = vld [vmem:[#allocation2 + $0x230] sm:$0xff] }
  0x38   :  { %380 = vmatprep.subr.mxu0 %v336_v14  ;;  %451 = vmatprep.subr.mxu1 %v338_v15  ;;  %v288_v62 = vld [vmem:[#allocation2 + $0x208] sm:$0xff]  ;;  %v290_v63 = vld [vmem:[#allocation2 + $0x218] sm:$0xff]  ;;  %v287_v1 = vld [vmem:[#allocation2 + $0x200] sm:$0xff]  ;;  %v109_v14 = vsub.s32 2, %v825_v4 }
  0x39   :  { %381 = vmatpush1.msra.mxu0 %v335_v16  ;;  %452 = vmatpush1.msra.mxu1 %v337_v17  ;;  %v289_v2 = vld [vmem:[#allocation2 + $0x210] sm:$0xff]  ;;  %v113_v17 = vsub.s32 3, %v825_v4 }
  0x3a   :  { %382 = vmatprep.subr.mxu0 %v332_v18  ;;  %453 = vmatprep.subr.mxu1 %v334_v19  ;;  %v97_v6 = vld [vmem:[%s967_s1] ss:$8 sm:$0xf] }
  0x3b   :  { %383 = vmatpush1.msra.mxu0 %v331_v20  ;;  %454 = vmatpush1.msra.mxu1 %v333_v21  ;;  %v102_v8 = vrot.slane %v97_v6, %v101_v5  ;;  %v106_v9 = vrot.slane %v97_v6, %v105_v7  ;;  %v110_v16 = vrot.slane %v97_v6, %v109_v14  ;;  %v560_v3 = vld [vmem:[%s969_s3 + $0x90] sm:$0xff] }
  0x3c   :  { %384 = vmatprep.subr.mxu0 %v328_v22  ;;  %455 = vmatprep.subr.mxu1 %v330_v23  ;;  %v114_v20 = vrot.slane %v97_v6, %v113_v17  ;;  %v544_v6 = vld [vmem:[%s969_s3 + $0x10] sm:$0xff] }
  0x3d   :  { %385 = vmatpush1.msra.mxu0 %v327_v24  ;;  %456 = vmatpush1.msra.mxu1 %v329_v25 }
  0x3e   :  { %386 = vmatprep.subr.mxu0 %v324_v26  ;;  %457 = vmatprep.subr.mxu1 %v326_v27 }
  0x3f   :  { %387 = vmatpush1.msra.mxu0 %v323_v28  ;;  %458 = vmatpush1.msra.mxu1 %v325_v29 }
  0x40   :  { %388 = vmatprep.subr.mxu0 %v320_v30  ;;  %459 = vmatprep.subr.mxu1 %v322_v31  ;;  %v280_v31 = vld [vmem:[%s967_s1 + $0x2] ss:$0 sm:$0xff] }
  0x41   :  { %389 = vmatpush1.msra.mxu0 %v319_v32  ;;  %460 = vmatpush1.msra.mxu1 %v321_v33 }
  0x42   :  { %390 = vmatprep.subr.mxu0 %v316_v34  ;;  %461 = vmatprep.subr.mxu1 %v318_v35 }
  0x43   :  { %391 = vmatpush1.msra.mxu0 %v315_v36  ;;  %462 = vmatpush1.msra.mxu1 %v317_v37 }
  0x44   :  { %392 = vmatprep.subr.mxu0 %v312_v38  ;;  %463 = vmatprep.subr.mxu1 %v314_v39 }
  0x45   :  { %393 = vmatpush1.msra.mxu0 %v311_v40  ;;  %464 = vmatpush1.msra.mxu1 %v313_v41  ;;  %v573_v40 = vld [vmem:[%s969_s3 + $0xf8] sm:$0xff] }
  0x46   :  { %394 = vmatprep.subr.mxu0 %v308_v42  ;;  %465 = vmatprep.subr.mxu1 %v310_v43  ;;  %v557_v41 = vld [vmem:[%s969_s3 + $0x78] sm:$0xff]  ;;  %v572_v42 = vld [vmem:[%s969_s3 + $0xf0] sm:$0xff] }
  0x47   :  { %395 = vmatpush1.msra.mxu0 %v307_v44  ;;  %466 = vmatpush1.msra.mxu1 %v309_v45  ;;  %v556_v43 = vld [vmem:[%s969_s3 + $0x70] sm:$0xff]  ;;  %v571_v44 = vld [vmem:[%s969_s3 + $0xe8] sm:$0xff] }
  0x48   :  { %396 = vmatprep.subr.mxu0 %v304_v46  ;;  %467 = vmatprep.subr.mxu1 %v306_v47  ;;  %v555_v45 = vld [vmem:[%s969_s3 + $0x68] sm:$0xff]  ;;  %v570_v46 = vld [vmem:[%s969_s3 + $0xe0] sm:$0xff] }
  0x49   :  { %397 = vmatpush1.msra.mxu0 %v303_v48  ;;  %468 = vmatpush1.msra.mxu1 %v305_v49  ;;  %v554_v47 = vld [vmem:[%s969_s3 + $0x60] sm:$0xff]  ;;  %v569_v48 = vld [vmem:[%s969_s3 + $0xd8] sm:$0xff] }
  0x4a   :  { %398 = vmatprep.subr.mxu0 %v300_v50  ;;  %469 = vmatprep.subr.mxu1 %v302_v51  ;;  %v553_v49 = vld [vmem:[%s969_s3 + $0x58] sm:$0xff]  ;;  %v568_v50 = vld [vmem:[%s969_s3 + $0xd0] sm:$0xff] }
  0x4b   :  { %399 = vmatpush1.msra.mxu0 %v299_v52  ;;  %470 = vmatpush1.msra.mxu1 %v301_v53  ;;  %v552_v51 = vld [vmem:[%s969_s3 + $0x50] sm:$0xff]  ;;  %v567_v52 = vld [vmem:[%s969_s3 + $0xc8] sm:$0xff] }
  0x4c   :  { %400 = vmatprep.subr.mxu0 %v296_v54  ;;  %471 = vmatprep.subr.mxu1 %v298_v55  ;;  %v551_v53 = vld [vmem:[%s969_s3 + $0x48] sm:$0xff]  ;;  %v566_v54 = vld [vmem:[%s969_s3 + $0xc0] sm:$0xff] }
  0x4d   :  { %401 = vmatpush1.msra.mxu0 %v295_v56  ;;  %472 = vmatpush1.msra.mxu1 %v297_v57  ;;  %v550_v55 = vld [vmem:[%s969_s3 + $0x40] sm:$0xff]  ;;  %v565_v56 = vld [vmem:[%s969_s3 + $0xb8] sm:$0xff] }
  0x4e   :  { %402 = vmatprep.subr.mxu0 %v292_v58  ;;  %473 = vmatprep.subr.mxu1 %v294_v59  ;;  %v549_v57 = vld [vmem:[%s969_s3 + $0x38] sm:$0xff]  ;;  %v564_v58 = vld [vmem:[%s969_s3 + $0xb0] sm:$0xff] }
  0x4f   :  { %403 = vmatpush1.msra.mxu0 %v291_v60  ;;  %474 = vmatpush1.msra.mxu1 %v293_v61  ;;  %v548_v59 = vld [vmem:[%s969_s3 + $0x30] sm:$0xff]  ;;  %v563_v60 = vld [vmem:[%s969_s3 + $0xa8] sm:$0xff] }
  0x50   :  { %404 = vmatprep.subr.mxu0 %v288_v62  ;;  %475 = vmatprep.subr.mxu1 %v290_v63  ;;  %v547_v61 = vld [vmem:[%s969_s3 + $0x28] sm:$0xff]  ;;  %v562_v62 = vld [vmem:[%s969_s3 + $0xa0] sm:$0xff] }
  0x51   :  { %405 = vmatpush1.msra.mxu0 %v287_v1  ;;  %476 = vmatpush1.msra.mxu1 %v289_v2  ;;  %v546_v63 = vld [vmem:[%s969_s3 + $0x20] sm:$0xff]  ;;  %v561_v1 = vld [vmem:[%s969_s3 + $0x98] sm:$0xff] }
  0x52   :  { %669 = vmatprep.subr.mxu0 %v573_v40  ;;  %v545_v2 = vld [vmem:[%s969_s3 + $0x18] sm:$0xff] }
  0xf0   :  { %v185_v10 = vpop.f32.mrf.mxu0  ;;  %v256_v18 = vpop.f32.mrf.mxu1 }
  0xf1   :  { %v186_v11 = vadd.f32 %v185_v10, %v102_v8  ;;  %v257_v19 = vadd.f32 %v256_v18, %v110_v16  ;;  %v559_v8 = vld [vmem:[%s969_s3 + $0x88] sm:$0xff]  ;;  %v558_v10 = vld [vmem:[%s969_s3 + $0x80] sm:$0xff] }
  0xf2   :  { %v187_v12 = vpop.f32.mrf.mxu0  ;;  %v258_v21 = vpop.f32.mrf.mxu1 }
  0xf3   :  { %v662_v0 = vmul.f32 -1.442695, %v186_v11  ;;  %v188_v13 = vadd.f32 %v187_v12, %v106_v9  ;;  %v664_v22 = vmul.f32 -1.442695, %v257_v19  ;;  %v259_v23 = vadd.f32 %v258_v21, %v114_v20  ;;  %v543_v9 = vld [vmem:[%s969_s3 + $0x8] sm:$0xff]  ;;  %v542_v11 = vld [vmem:[%s969_s3] sm:$0xff] }
  0xf4   :  { %v665_v12 = vld [vmem:[%s967_s1 + $0x1] ss:$8 sm:$0xf] }
  0xf5   :  { %709 = vpow2.f32 %v662_v0  ;;  %v663_v15 = vmul.f32 -1.442695, %v188_v13  ;;  %v357_v0 = vrot.slane %v665_v12, %v101_v5  ;;  %v361_v13 = vrot.slane %v665_v12, %v105_v7 }
  0xf7   :  { %711 = vpow2.f32 %v663_v15 }
  0xf8   :  { %713 = vpow2.f32 %v664_v22  ;;  %v365_v22 = vrot.slane %v665_v12, %v109_v14  ;;  %v535_v14 = vld [vmem:[%s967_s1 + $0x3] ss:$0 sm:$0xff] }
  0xf9   :  { %715 = vtanh.f32 %v259_v23 }
 0x102   :  { %v710_v24 = vpop.eup %709 }
 0x103   :  { %v270_v25 = vadd.f32 1.0, %v710_v24 }
 0x104   :  { %v712_v26 = vpop.eup %711 }
 0x105   :  { %717 = vrcp.f32 %v270_v25  ;;  %v271_v27 = vadd.f32 1.0, %v712_v26  ;;  %v714_v28 = vpop.eup %713  ;;  %v369_v25 = vrot.slane %v665_v12, %v113_v17 }
 0x106   :  { %v716_v29 = vpop.eup %715  ;;  %v272_v33 = vadd.f32 1.0, %v714_v28 }
 0x107   :  { %719 = vrcp.f32 %v271_v27 }
 0x108   :  { %721 = vrcp.f32 %v272_v33 }
 0x112   :  { %v718_v30 = vpop.eup %717 }
 0x113   :  { %v282_v35 = vmul.f32 %v718_v30, %v716_v29 }
 0x114   :  { %v720_v32 = vpop.eup %719 }
 0x115   :  { %v281_v34 = vmul.f32 %v720_v32, %v280_v31  ;;  %v722_v37 = vpop.eup %721 }
 0x117   :  { %v283_v36 = vadd.f32 %v282_v35, %v281_v34 }
 0x119   :  { %723 = vtanh.f32 %v283_v36 }
 0x126   :  { %v724_v38 = vpop.eup %723 }
 0x127   :  { %v845_v39 = vmul.f32 %v724_v38, %v722_v37 }
 0x129   :  { %439 = vmatmul.mubr.f32.vlgmr.msra.gmra.mxu0 %v845_v39  ;;  %510 = vmatmul.mubr.f32.vlgmr.msra.gmra.mxu1 %v845_v39 }
 0x12a   :  { %670 = vmatpush3.msra.mxu0 %v557_v41 }
 0x12b   :  { %671 = vmatprep.subr.mxu0 %v572_v42  ;;  %v541_v42 = vld [vmem:[%s967_s1 + $0x4] ss:$0 sm:$0xff] }
 0x12c   :  { %672 = vmatpush3.msra.mxu0 %v556_v43 }
 0x12d   :  { %673 = vmatprep.subr.mxu0 %v571_v44 }
 0x12e   :  { %674 = vmatpush3.msra.mxu0 %v555_v45 }
 0x12f   :  { %675 = vmatprep.subr.mxu0 %v570_v46 }
 0x130   :  { %676 = vmatpush3.msra.mxu0 %v554_v47 }
 0x131   :  { %677 = vmatprep.subr.mxu0 %v569_v48 }
 0x132   :  { %678 = vmatpush3.msra.mxu0 %v553_v49 }
 0x133   :  { %679 = vmatprep.subr.mxu0 %v568_v50 }
 0x134   :  { %680 = vmatpush3.msra.mxu0 %v552_v51 }
 0x135   :  { %681 = vmatprep.subr.mxu0 %v567_v52 }
 0x136   :  { %682 = vmatpush3.msra.mxu0 %v551_v53 }
 0x137   :  { %683 = vmatprep.subr.mxu0 %v566_v54 }
 0x138   :  { %684 = vmatpush3.msra.mxu0 %v550_v55 }
 0x139   :  { %685 = vmatprep.subr.mxu0 %v565_v56 }
 0x13a   :  { %686 = vmatpush3.msra.mxu0 %v549_v57 }
 0x13b   :  { %687 = vmatprep.subr.mxu0 %v564_v58 }
 0x13c   :  { %688 = vmatpush3.msra.mxu0 %v548_v59 }
 0x13d   :  { %689 = vmatprep.subr.mxu0 %v563_v60 }
 0x13e   :  { %690 = vmatpush3.msra.mxu0 %v547_v61 }
 0x13f   :  { %691 = vmatprep.subr.mxu0 %v562_v62 }
 0x140   :  { %692 = vmatpush3.msra.mxu0 %v546_v63 }
 0x141   :  { %693 = vmatprep.subr.mxu0 %v561_v1 }
 0x142   :  { %694 = vmatpush3.msra.mxu0 %v545_v2 }
 0x143   :  { %695 = vmatprep.subr.mxu0 %v560_v3 }
 0x144   :  { %696 = vmatpush3.msra.mxu0 %v544_v6 }
 0x145   :  { %697 = vmatprep.subr.mxu0 %v559_v8 }
 0x146   :  { %698 = vmatpush3.msra.mxu0 %v543_v9 }
 0x147   :  { %699 = vmatprep.subr.mxu0 %v558_v10 }
 0x148   :  { %700 = vmatpush3.msra.mxu0 %v542_v11 }
 0x1e9   :  { %v440_v15 = vpop.f32.mrf.mxu0  ;;  %v511_v23 = vpop.f32.mrf.mxu1 }
 0x1ea   :  { %v441_v16 = vadd.f32 %v440_v15, %v357_v0  ;;  %v512_v24 = vadd.f32 %v511_v23, %v365_v22 }
 0x1eb   :  { %v442_v18 = vpop.f32.mrf.mxu0  ;;  %v513_v5 = vpop.f32.mrf.mxu1 }
 0x1ec   :  { %v666_v19 = vmul.f32 -1.442695, %v441_v16  ;;  %v443_v20 = vadd.f32 %v442_v18, %v361_v13  ;;  %v668_v26 = vmul.f32 -1.442695, %v512_v24  ;;  %v514_v7 = vadd.f32 %v513_v5, %v369_v25 }
 0x1ee   :  { %725 = vpow2.f32 %v666_v19  ;;  %v667_v21 = vmul.f32 -1.442695, %v443_v20 }
 0x1f0   :  { %727 = vpow2.f32 %v667_v21 }
 0x1f1   :  { %729 = vpow2.f32 %v668_v26 }
 0x1fb   :  { %v726_v27 = vpop.eup %725 }
 0x1fc   :  { %v525_v28 = vadd.f32 1.0, %v726_v27 }
 0x1fd   :  { %v728_v29 = vpop.eup %727 }
 0x1fe   :  { %731 = vrcp.f32 %v525_v28  ;;  %v526_v30 = vadd.f32 1.0, %v728_v29  ;;  %v730_v31 = vpop.eup %729 }
 0x1ff   :  { %733 = vtanh.f32 %v514_v7  ;;  %v527_v17 = vadd.f32 1.0, %v730_v31 }
 0x200   :  { %735 = vrcp.f32 %v526_v30 }
 0x201   :  { %737 = vrcp.f32 %v527_v17 }
 0x20b   :  { %v732_v32 = vpop.eup %731 }
 0x20c   :  { %v734_v33 = vpop.eup %733 }
 0x20d   :  { %v736_v4 = vpop.eup %735  ;;  %v537_v35 = vmul.f32 %v734_v33, %v732_v32 }
 0x20e   :  { %v536_v34 = vmul.f32 %v736_v4, %v535_v14  ;;  %v738_v37 = vpop.eup %737 }
 0x210   :  { %v538_v36 = vadd.f32 %v537_v35, %v536_v34 }
 0x212   :  { %739 = vtanh.f32 %v538_v36 }
 0x21f   :  { %v740_v38 = vpop.eup %739 }
 0x220   :  { %v540_v40 = vmul.f32 %v740_v38, %v738_v37 }
 0x222   :  { %638 = vmatprep.mubr.f32.mxu0 %v540_v40 }
 0x223   :  { %639 = vmatmul.mubr.f32.vlgmr.msra.gmra.mxu0 %v845_v39 }
 0x2e3   :  { %v701_v41 = vpop.f32.mrf.mxu0 }
 0x2e5   :  { %v702_v43 = vpop.f32.mrf.mxu0 }
 0x2e6   :  { %v703_v44 = vadd.f32 %v702_v43, %v701_v41 }
 0x2e8   :  { %v644_v45 = vadd.f32 %v703_v44, %v541_v42 }
 0x2ea   :  { %646 = vst.msk [vmem:[#allocation5] sm:$0x1] %vm645_vm0, %v644_v45 }
 0x2eb   :  { %772 = shalt.err (!%p769_p9)
}
 0x2ec   :  { %656 = dma.vmem_to_hbm [thread:$0]  %s654_s14, 16, %s970_s4, [#allocation4]  }
 0x2ed   :  { %783 = dma.done.wait [#allocation4], 16  }
 0x2ee   :  { %784 = vsyncadd [#allocation4], 4294967280 }
 0x2ef   :  { %660 = vsyncpa [#allocation3], 1 }
 0x2f0   :  { %661 = vsyncpa [#allocation4], 1 }

</bundles_post_ra>
